<compile_context>
chip_gen: v6e
topology: v6e:2x2x1
jax: 0.10.0
libtpu: 0.0.40
codegen_flags: <defaults>
</compile_context>

<pallas_src>
import jax
import jax.numpy as jnp
from jax.experimental import pallas as pl
from jax.experimental.pallas import tpu as pltpu


def fcnet_kernel(xt_ref, w1_ref, b1_ref, w2_ref, b2_ref, w3_ref, b3_ref, o_ref):
    # layer1: [64,4]bf16 @ [4,TB]bf16 -> [64,TB] f32, +bias, ReLU
    h = jnp.dot(w1_ref[...], xt_ref[...], preferred_element_type=jnp.float32)
    h = jnp.maximum(h + b1_ref[...], 0.0)
    # layer2: [64,64]bf16 @ [64,TB]bf16 -> [64,TB] f32, +bias, ReLU
    h = jnp.dot(w2_ref[...], h.astype(w2_ref.dtype),
                preferred_element_type=jnp.float32)
    h = jnp.maximum(h + b2_ref[...], 0.0)
    # layer3: Linear(64,1) == per-lane dot with a [64,1] column.
    # N=1 would waste an MXU pass, so do it on the VPU + cross-sublane reduce.
    out = jnp.sum(h * w3_ref[...], axis=0, keepdims=True)   # [1, TB]
    o_ref[...] = (out + b3_ref[...]).astype(o_ref.dtype)


def fcnet_forward(x, params, *, tb=4096):
    """x: [B, 4] float32 -> [B, 1] float32."""
    w1, b1, w2, b2, w3, b3 = params
    B = x.shape[0]

    # 128-aligned batch tile (fits comfortably in VMEM even on v7x's 64 MiB:
    # per step ~ 4*TB bf16 + 64*TB f32 + TB f32, double-buffered).
    tb = max(128, min(tb, pl.cdiv(B, 128) * 128))
    b_pad = pl.cdiv(B, tb) * tb

    # Wrapper-side layout glue (not the hot path): pad batch, transpose to
    # batch-on-lanes, cast matmul operands to bf16, reshape biases/W3 to
    # broadcastable columns.
    x_pad = jnp.pad(x, ((0, b_pad - B), (0, 0)))
    xt = x_pad.T.astype(jnp.bfloat16)                 # [4, B_pad]
    w1b = w1.astype(jnp.bfloat16)                     # [64, 4]
    w2b = w2.astype(jnp.bfloat16)                     # [64, 64]
    w3c = w3.T.astype(jnp.float32)                    # [64, 1]
    b1c = b1.reshape(-1, 1).astype(jnp.float32)       # [64, 1]
    b2c = b2.reshape(-1, 1).astype(jnp.float32)       # [64, 1]
    b3c = b3.reshape(1, 1).astype(jnp.float32)        # [1, 1]

    resident = lambda shape: pl.BlockSpec(shape, lambda i: (0, 0))

    out_t = pl.pallas_call(
        fcnet_kernel,
        out_shape=jax.ShapeDtypeStruct((1, b_pad), jnp.float32),
        grid=(b_pad // tb,),
        in_specs=[
            pl.BlockSpec((4, tb), lambda i: (0, i)),   # x tile (batch on lanes)
            resident(w1b.shape), resident(b1c.shape),
            resident(w2b.shape), resident(b2c.shape),
            resident(w3c.shape), resident(b3c.shape),
        ],
        out_specs=pl.BlockSpec((1, tb), lambda i: (0, i)),  # lane-dense output
        compiler_params=pltpu.CompilerParams(
            dimension_semantics=("parallel",)),
    )(xt, w1b, b1c, w2b, b2c, w3c, b3c)

    return out_t[:, :B].T                              # [B, 1]


def init_fcnet_params(key):
    """xavier_uniform_ weights, zero biases (matches FCNet._create_weights)."""
    def xavier_uniform(k, out_f, in_f):
        bound = (6.0 / (in_f + out_f)) ** 0.5
        # PyTorch nn.Linear weight shape is [out_features, in_features].
        return jax.random.uniform(k, (out_f, in_f), jnp.float32, -bound, bound)

    k1, k2, k3 = jax.random.split(key, 3)
    w1 = xavier_uniform(k1, 64, 4)
    b1 = jnp.zeros((64,), jnp.float32)
    w2 = xavier_uniform(k2, 64, 64)
    b2 = jnp.zeros((64,), jnp.float32)
    w3 = xavier_uniform(k3, 1, 64)
    b3 = jnp.zeros((1,), jnp.float32)
    return (w1, b1, w2, b2, w3, b3)


def fcnet_reference(x, params):
    """Pure-JAX f32 reference mirroring the PyTorch forward."""
    w1, b1, w2, b2, w3, b3 = params
    h = jnp.maximum(x @ w1.T + b1, 0.0)
    h = jnp.maximum(h @ w2.T + b2, 0.0)
    return h @ w3.T + b3


if __name__ == "__main__":
    key = jax.random.PRNGKey(0)
    pkey, xkey = jax.random.split(key)
    params = init_fcnet_params(pkey)

    batch = 8
    x = jax.random.normal(xkey, (batch, 4), jnp.float32)

    out = jax.block_until_ready(fcnet_forward(x, params))
    ref = fcnet_reference(x, params)

    assert out.shape == (batch, 1), out.shape
    # bf16 matmul operands (f32 accumulation) vs f32 reference -> loose tol.
    assert jnp.allclose(out, ref, atol=3e-2, rtol=3e-2), (out, ref)
    print("KERNEL_OK")
</pallas_src>

<mosaic_0001>
module attributes {stable_mosaic.version = 11 : i64} {
  func.func @fcnet_kernel(%arg0: i32, %arg1: memref<4x128xbf16, #tpu.memory_space<vmem>>, %arg2: memref<64x4xbf16, #tpu.memory_space<vmem>>, %arg3: memref<64x1xf32, #tpu.memory_space<vmem>>, %arg4: memref<64x64xbf16, #tpu.memory_space<vmem>>, %arg5: memref<64x1xf32, #tpu.memory_space<vmem>>, %arg6: memref<64x1xf32, #tpu.memory_space<vmem>>, %arg7: memref<1x1xf32, #tpu.memory_space<vmem>>, %arg8: memref<1x128xf32, #tpu.memory_space<vmem>>) attributes {dimension_semantics = [#tpu.dimension_semantics<parallel>], iteration_bounds = array<i64: 1>, scalar_prefetch = 0 : i64, scratch_operands = 0 : i64, tpu.core_type = #tpu.core_type<tc>, window_params = [{transform_indices = @transform_0, window_bounds = array<i64: 4, 128>}, {pipeline_mode = #tpu.pipeline_mode<synchronous>, transform_indices = @transform_1, window_bounds = array<i64: 64, 4>}, {pipeline_mode = #tpu.pipeline_mode<synchronous>, transform_indices = @transform_2, window_bounds = array<i64: 64, 1>}, {pipeline_mode = #tpu.pipeline_mode<synchronous>, transform_indices = @transform_3, window_bounds = array<i64: 64, 64>}, {pipeline_mode = #tpu.pipeline_mode<synchronous>, transform_indices = @transform_4, window_bounds = array<i64: 64, 1>}, {pipeline_mode = #tpu.pipeline_mode<synchronous>, transform_indices = @transform_5, window_bounds = array<i64: 64, 1>}, {pipeline_mode = #tpu.pipeline_mode<synchronous>, transform_indices = @transform_6, window_bounds = array<i64: 1, 1>}, {transform_indices = @transform_7, window_bounds = array<i64: 1, 128>}]} {
    %c0 = arith.constant 0 : index
    %c0_0 = arith.constant 0 : index
    %0 = vector.load %arg2[%c0, %c0_0] : memref<64x4xbf16, #tpu.memory_space<vmem>>, vector<64x4xbf16>
    %c0_1 = arith.constant 0 : index
    %c0_2 = arith.constant 0 : index
    %1 = vector.load %arg1[%c0_1, %c0_2] : memref<4x128xbf16, #tpu.memory_space<vmem>>, vector<4x128xbf16>
    %cst = arith.constant dense<0.000000e+00> : vector<64x128xf32>
    %2 = tpu.matmul %0, %1, %cst {dimension_numbers = #tpu.dot_dimension_numbers<[1], [0], [0], [1], [0, 0, 1, 1], [], []>} : vector<64x4xbf16>, vector<4x128xbf16>, vector<64x128xf32> -> vector<64x128xf32>
    %c0_3 = arith.constant 0 : index
    %c0_4 = arith.constant 0 : index
    %3 = vector.load %arg3[%c0_3, %c0_4] : memref<64x1xf32, #tpu.memory_space<vmem>>, vector<64x1xf32>
    %4 = vector.broadcast %3 : vector<64x1xf32> to vector<64x128xf32>
    %5 = arith.addf %2, %4 : vector<64x128xf32>
    %cst_5 = arith.constant 0.000000e+00 : f32
    %6 = vector.broadcast %cst_5 : f32 to vector<64x128xf32>
    %7 = arith.maximumf %5, %6 : vector<64x128xf32>
    %c0_6 = arith.constant 0 : index
    %c0_7 = arith.constant 0 : index
    %8 = vector.load %arg4[%c0_6, %c0_7] : memref<64x64xbf16, #tpu.memory_space<vmem>>, vector<64x64xbf16>
    %9 = arith.truncf %7 : vector<64x128xf32> to vector<64x128xbf16>
    %cst_8 = arith.constant dense<0.000000e+00> : vector<64x128xf32>
    %10 = tpu.matmul %8, %9, %cst_8 {dimension_numbers = #tpu.dot_dimension_numbers<[1], [0], [0], [1], [0, 0, 1, 1], [], []>} : vector<64x64xbf16>, vector<64x128xbf16>, vector<64x128xf32> -> vector<64x128xf32>
    %c0_9 = arith.constant 0 : index
    %c0_10 = arith.constant 0 : index
    %11 = vector.load %arg5[%c0_9, %c0_10] : memref<64x1xf32, #tpu.memory_space<vmem>>, vector<64x1xf32>
    %12 = vector.broadcast %11 : vector<64x1xf32> to vector<64x128xf32>
    %13 = arith.addf %10, %12 : vector<64x128xf32>
    %cst_11 = arith.constant 0.000000e+00 : f32
    %14 = vector.broadcast %cst_11 : f32 to vector<64x128xf32>
    %15 = arith.maximumf %13, %14 : vector<64x128xf32>
    %c0_12 = arith.constant 0 : index
    %c0_13 = arith.constant 0 : index
    %16 = vector.load %arg6[%c0_12, %c0_13] : memref<64x1xf32, #tpu.memory_space<vmem>>, vector<64x1xf32>
    %17 = vector.broadcast %16 : vector<64x1xf32> to vector<64x128xf32>
    %18 = arith.mulf %15, %17 : vector<64x128xf32>
    %cst_14 = arith.constant dense<0.000000e+00> : vector<128xf32>
    %19 = vector.multi_reduction <add>, %18, %cst_14 [0] : vector<64x128xf32> to vector<128xf32>
    %20 = vector.shape_cast %19 : vector<128xf32> to vector<1x128xf32>
    %c0_15 = arith.constant 0 : index
    %c0_16 = arith.constant 0 : index
    %21 = vector.load %arg7[%c0_15, %c0_16] : memref<1x1xf32, #tpu.memory_space<vmem>>, vector<1x1xf32>
    %22 = vector.broadcast %21 : vector<1x1xf32> to vector<1x128xf32>
    %23 = arith.addf %20, %22 : vector<1x128xf32>
    %c0_17 = arith.constant 0 : index
    %c0_18 = arith.constant 0 : index
    %24 = vector.load %arg8[%c0_17, %c0_18] : memref<1x128xf32, #tpu.memory_space<vmem>>, vector<1x128xf32>
    tpu.vector_store %arg8[%c0_17, %c0_18], %23 {strides = array<i32>} : memref<1x128xf32, #tpu.memory_space<vmem>>, vector<1x128xf32>,
    return
  }
  func.func @transform_0(%arg0: i32) -> (i32, i32) {
    %c0_i32 = arith.constant 0 : i32
    %c0_i32_0 = arith.constant 0 : i32
    return %c0_i32, %arg0 : i32, i32
  }
  func.func @transform_1(%arg0: i32) -> (i32, i32) {
    %c0_i32 = arith.constant 0 : i32
    %c0_i32_0 = arith.constant 0 : i32
    %c0_i32_1 = arith.constant 0 : i32
    return %c0_i32, %c0_i32_0 : i32, i32
  }
  func.func @transform_2(%arg0: i32) -> (i32, i32) {
    %c0_i32 = arith.constant 0 : i32
    %c0_i32_0 = arith.constant 0 : i32
    %c0_i32_1 = arith.constant 0 : i32
    return %c0_i32, %c0_i32_0 : i32, i32
  }
  func.func @transform_3(%arg0: i32) -> (i32, i32) {
    %c0_i32 = arith.constant 0 : i32
    %c0_i32_0 = arith.constant 0 : i32
    %c0_i32_1 = arith.constant 0 : i32
    return %c0_i32, %c0_i32_0 : i32, i32
  }
  func.func @transform_4(%arg0: i32) -> (i32, i32) {
    %c0_i32 = arith.constant 0 : i32
    %c0_i32_0 = arith.constant 0 : i32
    %c0_i32_1 = arith.constant 0 : i32
    return %c0_i32, %c0_i32_0 : i32, i32
  }
  func.func @transform_5(%arg0: i32) -> (i32, i32) {
    %c0_i32 = arith.constant 0 : i32
    %c0_i32_0 = arith.constant 0 : i32
    %c0_i32_1 = arith.constant 0 : i32
    return %c0_i32, %c0_i32_0 : i32, i32
  }
  func.func @transform_6(%arg0: i32) -> (i32, i32) {
    %c0_i32 = arith.constant 0 : i32
    %c0_i32_0 = arith.constant 0 : i32
    %c0_i32_1 = arith.constant 0 : i32
    return %c0_i32, %c0_i32_0 : i32, i32
  }
  func.func @transform_7(%arg0: i32) -> (i32, i32) {
    %c0_i32 = arith.constant 0 : i32
    %c0_i32_0 = arith.constant 0 : i32
    return %c0_i32, %arg0 : i32, i32
  }
}

</mosaic_0001>

<bundles_post_ra>
// kernel: tpu_custom_call.1
= control target key start
LH: loop header
LB: loop body
LE: loop exit
PB: predicated region body
PF: predicated region fallthrough
CT: control target
= control target key end

     0   :  { %s711_s0 = inlined_call_operand.vmem [shape: bf16[4,128], index: 0, kind: input, shape index: {}]   ;;  %s712_s1 = inlined_call_operand.vmem [shape: bf16[64,4], index: 1, kind: input, shape index: {}]   ;;  %s713_s2 = inlined_call_operand.vmem [shape: f32[64,1], index: 2, kind: input, shape index: {}]   ;;  %s714_s3 = inlined_call_operand.vmem [shape: bf16[64,64], index: 3, kind: input, shape index: {}]   ;;  %s715_s4 = inlined_call_operand.vmem [shape: f32[64,1], index: 4, kind: input, shape index: {}]   ;;  %s716_s5 = inlined_call_operand.vmem [shape: f32[64,1], index: 5, kind: input, shape index: {}]   ;;  %s717_s6 = inlined_call_operand.<no memory space> [shape: f32[1,1], index: 6, kind: input, shape index: {}]   ;;  %s718_s7 = inlined_call_operand.hbm [shape: f32[1,128], index: 7, kind: output, shape index: {}]  }
   0x1   :  { %v12_v0 = vstv %s717_s6 }
   0x2   :  { %13 = vst [vmem:[#allocation2] sm:$0x1] %v12_v0 }
   0x3   :  { %v38_v1 = vld [vmem:[%s711_s0] sm:$0x3]  ;;  %vm120_vm0 = vcmask 1041408   ;;  %vm107_vm1 = vcmask 31744   ;;  %v527_v4 = vld [vmem:[%s712_s1 + $0x8] sm:$0xff]   ;;  %v528_v5 = vld [vmem:[%s712_s1 + $0x10] sm:$0xff]  }
   0x4   :  { %v526_v2 = vld [vmem:[%s712_s1] sm:$0xff]   ;;  %521 = vmatprep.subr.msk.bf16.mxu0 %vm120_vm0, %v38_v1  ;;  %v122_v3 = vsel %vm120_vm0, %v38_v1, 0  ;;  %v556_v6 = vmov 0   ;;  %v45_v7 = vld [vmem:[%s713_s2 + $0x30] sm:$0xff]  ;;  %v46_v9 = vld [vmem:[%s713_s2 + $0x38] sm:$0xff] }
   0x5   :  { %488 = vmatpush3.bf16.msra.mxu0 %v122_v3  ;;  %489 = vmatprep.mubr.msk.bf16.mxu0 %vm107_vm1, %v526_v2  ;;  %v43_v8 = vld [vmem:[%s713_s2 + $0x20] sm:$0xff]  ;;  %v44_v10 = vld [vmem:[%s713_s2 + $0x28] sm:$0xff]  ;;  %v529_v11 = vld [vmem:[%s712_s1 + $0x18] sm:$0xff]  }
   0x6   :  { %524 = vset.pattern.permute.xlu0 %v556_v6  ;;  %525 = vset.pattern.permute.xlu1 %v556_v6  ;;  %v41_v12 = vld [vmem:[%s713_s2 + $0x10] sm:$0xff]  ;;  %v42_v13 = vld [vmem:[%s713_s2 + $0x18] sm:$0xff]  ;;  %v39_v14 = vld [vmem:[%s713_s2] sm:$0xff] }
   0x7   :  { %79 = vperm.xlu0 %524, %v45_v7   ;;  %69 = vperm.xlu1 %525, %v43_v8   ;;  %v40_v15 = vld [vmem:[%s713_s2 + $0x8] sm:$0xff] }
   0x8   :  { %490 = vmatmul.mubr.msk.bf16.vlgmr.msra.gmra.mxu0 %vm107_vm1, %v527_v4 }
   0x9   :  { %493 = vmatprep.mubr.msk.bf16.mxu0 %vm107_vm1, %v528_v5 }
   0xb   :  { %84 = vperm.xlu0 %524, %v46_v9   ;;  %74 = vperm.xlu1 %525, %v44_v10  }
   0xf   :  { %59 = vperm.xlu0 %524, %v41_v12   ;;  %64 = vperm.xlu1 %525, %v42_v13  }
  0x10   :  { %494 = vmatmul.mubr.msk.bf16.gmra.mxu0 %vm107_vm1, %v529_v11 }
  0x11   :  { %14 = vsyncpa [#allocation4], 0  ;;  %v209_v16 = vld [vmem:[%s715_s4] sm:$0xff]  ;;  %v210_v17 = vld [vmem:[%s715_s4 + $0x8] sm:$0xff]  ;;  %vm277_vm2 = vcmask 523264  }
  0x12   :  { %v211_v18 = vld [vmem:[%s715_s4 + $0x10] sm:$0xff]  ;;  %v212_v19 = vld [vmem:[%s715_s4 + $0x18] sm:$0xff]  ;;  %v363_v20 = vld [vmem:[%s716_s5] sm:$0xff] }
  0x13   :  { %49 = vperm.xlu0 %524, %v39_v14   ;;  %54 = vperm.xlu1 %525, %v40_v15   ;;  %v364_v21 = vld [vmem:[%s716_s5 + $0x8] sm:$0xff]  ;;  %v213_v22 = vld [vmem:[%s715_s4 + $0x20] sm:$0xff]  ;;  %v365_v23 = vld [vmem:[%s716_s5 + $0x10] sm:$0xff] }
  0x14   :  { %v214_v24 = vld [vmem:[%s715_s4 + $0x28] sm:$0xff]  ;;  %v366_v25 = vld [vmem:[%s716_s5 + $0x18] sm:$0xff]  ;;  %v215_v26 = vld [vmem:[%s715_s4 + $0x30] sm:$0xff] }
  0x15   :  { %v367_v27 = vld [vmem:[%s716_s5 + $0x20] sm:$0xff]  ;;  %v216_v28 = vld [vmem:[%s715_s4 + $0x38] sm:$0xff]  ;;  %v368_v29 = vld [vmem:[%s716_s5 + $0x28] sm:$0xff] }
  0x16   :  { %v369_v30 = vld [vmem:[%s716_s5 + $0x30] sm:$0xff]  ;;  %v370_v31 = vld [vmem:[%s716_s5 + $0x38] sm:$0xff]  ;;  %v432_v32 = vld [vmem:[#allocation2] sm:$0x1] }
  0x17   :  { %219 = vperm.xlu0 %524, %v209_v16   ;;  %224 = vperm.xlu1 %525, %v210_v17   ;;  %v530_v33 = vld [vmem:[%s714_s3] sm:$0xff]   ;;  %v531_v34 = vld [vmem:[%s714_s3 + $0x10] sm:$0xff]   ;;  %v532_v7 = vld [vmem:[%s714_s3 + $0x8] sm:$0xff]  }
  0x18   :  { %505 = vmatprep.mubr.msk.bf16.mxu0 %vm277_vm2, %v530_v33  ;;  %509 = vmatprep.mubr.msk.bf16.mxu1 %vm277_vm2, %v531_v34  ;;  %v533_v8 = vld [vmem:[%s714_s3 + $0x18] sm:$0xff]   ;;  %s557_s3 = smov [#allocation3]  }
  0x19   :  { %s450_s11 = sshll.u32 %s557_s3, 4  ;;  %s451_s11 = int_to_ptr.vmem [resolvable:$true] %s450_s11 }
  0x1a   :  { %s534_s12 = scalar_lea.vmem %s451_s11, 16  ;;  %s538_s13 = scalar_lea.vmem %s451_s11, 32 }
  0x1b   :  { %229 = vperm.xlu0 %524, %v211_v18   ;;  %234 = vperm.xlu1 %525, %v212_v19   ;;  %p535_p0 = scmp.ne.s32.totalorder %s451_s11, %s534_s12  ;;  %p539_p1 = scmp.lt.s32.totalorder %s451_s11, %s451_s11 }
  0x1c   :  { %p540_p2 = scmp.lt.s32.totalorder %s538_s13, %s534_s12 }
  0x1e   :  { %p541_p3 = por %p540_p2, %p539_p1 }
  0x1f   :  { %373 = vperm.xlu0 %524, %v363_v20   ;;  %378 = vperm.xlu1 %525, %v364_v21  }
  0x20   :  { %p542_p4 = pnand %p541_p3, %p535_p0 }
  0x23   :  { %239 = vperm.xlu0 %524, %v213_v22   ;;  %383 = vperm.xlu1 %525, %v365_v23  }
  0x27   :  { %244 = vperm.xlu0 %524, %v214_v24   ;;  %388 = vperm.xlu1 %525, %v366_v25  }
  0x2b   :  { %249 = vperm.xlu0 %524, %v215_v26   ;;  %393 = vperm.xlu1 %525, %v367_v27  }
  0x2f   :  { %254 = vperm.xlu0 %524, %v216_v28   ;;  %398 = vperm.xlu1 %525, %v368_v29  }
  0x33   :  { %403 = vperm.xlu0 %524, %v369_v30   ;;  %408 = vperm.xlu1 %525, %v370_v31  }
  0x37   :  { %435 = vperm.xlu0 %524, %v432_v32  }
  0x82   :  { %v70_v35 = vpop.permute.xlu1 %69  ;;  %v80_v37 = vpop.permute.xlu0 %79 }
  0x86   :  { %v75_v40 = vpop.permute.xlu1 %74  ;;  %v85_v42 = vpop.permute.xlu0 %84 }
  0x8a   :  { %v65_v46 = vpop.permute.xlu1 %64  ;;  %v60_v50 = vpop.permute.xlu0 %59 }
  0x8e   :  { %v55_v60 = vpop.permute.xlu1 %54  ;;  %v50_v0 = vpop.permute.xlu0 %49 }
  0x92   :  { %v220_v9 = vpop.permute.xlu0 %219  ;;  %v225_v10 = vpop.permute.xlu1 %224 }
  0x96   :  { %v230_v11 = vpop.permute.xlu0 %229  ;;  %v235_v12 = vpop.permute.xlu1 %234 }
  0x9a   :  { %v374_v13 = vpop.permute.xlu0 %373  ;;  %v379_v14 = vpop.permute.xlu1 %378 }
  0x9e   :  { %v240_v15 = vpop.permute.xlu0 %239  ;;  %v384_v16 = vpop.permute.xlu1 %383 }
  0xa2   :  { %v245_v19 = vpop.permute.xlu0 %244  ;;  %v389_v22 = vpop.permute.xlu1 %388 }
  0xa6   :  { %v250_v31 = vpop.permute.xlu0 %249 }
  0xc8   :  { %v491_v36 = vpop.f32.mrf.mxu0 }
  0xc9   :  { %v167_v56 = vadd.f32 %v491_v36, %v60_v50  ;;  %v394_v36 = vpop.permute.xlu1 %393 }
  0xca   :  { %v158_v38 = vpop.f32.mrf.mxu0 }
  0xcb   :  { %v191_v1 = vmax.f32 %v167_v56, 0.0  ;;  %v159_v2 = vadd.f32 %v158_v38, %v50_v0 }
  0xcc   :  { %v492_v39 = vpop.f32.mrf.mxu0 }
  0xcd   :  { %v170_v52 = vadd.f32 %v492_v39, %v65_v46  ;;  %v189_v5 = vmax.f32 %v159_v2, 0.0  ;;  %v399_v50 = vpop.permute.xlu1 %398 }
  0xce   :  { %v161_v41 = vpop.f32.mrf.mxu0 }
  0xcf   :  { %v192_v61 = vmax.f32 %v170_v52, 0.0  ;;  %v162_v62 = vadd.f32 %v161_v41, %v55_v60 }
  0xd0   :  { %v495_v43 = vpop.f32.mrf.mxu0 }
  0xd1   :  { %v183_v45 = vadd.f32 %v495_v43, %v80_v37  ;;  %v206_v3 = vpack.c.bf16 %v192_v61, %v191_v1  ;;  %v190_v4 = vmax.f32 %v162_v62, 0.0  ;;  %v409_v60 = vpop.permute.xlu1 %408 }
  0xd2   :  { %v174_v44 = vpop.f32.mrf.mxu0 }
  0xd3   :  { %v175_v48 = vadd.f32 %v174_v44, %v70_v35  ;;  %v195_v53 = vmax.f32 %v183_v45, 0.0  ;;  %v205_v6 = vpack.c.bf16 %v190_v4, %v189_v5  ;;  %v255_v45 = vpop.permute.xlu0 %254 }
  0xd4   :  { %v496_v47 = vpop.f32.mrf.mxu0 }
  0xd5   :  { %v186_v49 = vadd.f32 %v496_v47, %v85_v42  ;;  %v193_v57 = vmax.f32 %v175_v48, 0.0 }
  0xd6   :  { %v177_v51 = vpop.f32.mrf.mxu0 }
  0xd7   :  { %v196_v54 = vmax.f32 %v186_v49, 0.0  ;;  %v178_v55 = vadd.f32 %v177_v51, %v75_v40 }
  0xd9   :  { %v208_v58 = vpack.c.bf16 %v196_v54, %v195_v53  ;;  %v194_v59 = vmax.f32 %v178_v55, 0.0 }
  0xdb   :  { %v207_v63 = vpack.c.bf16 %v194_v59, %v193_v57  ;;  %497 = vmatprep.subr.bf16.mxu0 %v208_v58  ;;  %513 = vmatprep.subr.bf16.mxu1 %v208_v58  ;;  %v404_v57 = vpop.permute.xlu0 %403 }
  0xdc   :  { %498 = vmatpush3.bf16.msra.mxu0 %v208_v58  ;;  %517 = vmatpush3.bf16.msra.mxu1 %v208_v58 }
  0xdd   :  { %499 = vmatprep.subr.bf16.mxu0 %v207_v63  ;;  %514 = vmatprep.subr.bf16.mxu1 %v207_v63 }
  0xe0   :  { %500 = vmatpush3.bf16.msra.mxu0 %v207_v63  ;;  %518 = vmatpush3.bf16.msra.mxu1 %v207_v63  ;;  %v438_v63 = vlaneseq }
  0xe1   :  { %501 = vmatprep.subr.bf16.mxu0 %v206_v3  ;;  %515 = vmatprep.subr.bf16.mxu1 %v206_v3 }
  0xe2   :  { %v439_v2 = vshrl.u32 %v438_v63, 7 }
  0xe4   :  { %502 = vmatpush3.bf16.msra.mxu0 %v206_v3  ;;  %519 = vmatpush3.bf16.msra.mxu1 %v206_v3  ;;  %v440_v5 = vsub.s32 0, %v439_v2 }
  0xe5   :  { %503 = vmatprep.subr.bf16.mxu0 %v205_v6  ;;  %516 = vmatprep.subr.bf16.mxu1 %v205_v6 }
  0xe8   :  { %504 = vmatpush3.bf16.msra.mxu0 %v205_v6  ;;  %520 = vmatpush3.bf16.msra.mxu1 %v205_v6 }
  0xeb   :  { %506 = vmatmul.mubr.msk.bf16.vlgmr.msra.gmra.mxu0 %vm277_vm2, %v532_v7  ;;  %510 = vmatmul.mubr.msk.bf16.vlgmr.msra.gmra.mxu1 %vm277_vm2, %v533_v8  ;;  %v436_v7 = vpop.permute.xlu0 %435 }
 0x1ab   :  { %v507_v17 = vpop.f32.mrf.mxu0  ;;  %v511_v18 = vpop.f32.mrf.mxu1 }
 0x1ac   :  { %v333_v26 = vadd.f32 %v507_v17, %v230_v11  ;;  %v349_v42 = vadd.f32 %v511_v18, %v250_v31 }
 0x1ad   :  { %v324_v20 = vpop.f32.mrf.mxu0  ;;  %v340_v21 = vpop.f32.mrf.mxu1 }
 0x1ae   :  { %v325_v23 = vadd.f32 %v324_v20, %v220_v9  ;;  %v357_v33 = vmax.f32 %v333_v26, 0.0  ;;  %v341_v34 = vadd.f32 %v340_v21, %v240_v15  ;;  %v361_v51 = vmax.f32 %v349_v42, 0.0 }
 0x1af   :  { %v508_v24 = vpop.f32.mrf.mxu0  ;;  %v512_v25 = vpop.f32.mrf.mxu1  ;;  %v441_v9 = vrot.slane %v436_v7, %v440_v5 }
 0x1b0   :  { %v355_v28 = vmax.f32 %v325_v23, 0.0  ;;  %v336_v29 = vadd.f32 %v508_v24, %v235_v12  ;;  %v413_v41 = vmul.f32 %v384_v16, %v357_v33  ;;  %v359_v43 = vmax.f32 %v341_v34, 0.0 }
 0x1b1   :  { %v327_v27 = vpop.f32.mrf.mxu0  ;;  %v343_v32 = vpop.f32.mrf.mxu1  ;;  %v352_v47 = vadd.f32 %v512_v25, %v255_v45  ;;  %v417_v58 = vmul.f32 %v404_v57, %v361_v51 }
 0x1b2   :  { %v328_v30 = vadd.f32 %v327_v27, %v225_v10  ;;  %v411_v37 = vmul.f32 %v374_v13, %v355_v28  ;;  %v358_v38 = vmax.f32 %v336_v29, 0.0  ;;  %v344_v40 = vadd.f32 %v343_v32, %v245_v19 }
 0x1b3   :  { %v415_v52 = vmul.f32 %v394_v36, %v359_v43  ;;  %v362_v54 = vmax.f32 %v352_v47, 0.0 }
 0x1b4   :  { %v356_v35 = vmax.f32 %v328_v30, 0.0  ;;  %v414_v46 = vmul.f32 %v389_v22, %v358_v38  ;;  %v360_v49 = vmax.f32 %v344_v40, 0.0 }
 0x1b5   :  { %v418_v61 = vmul.f32 %v409_v60, %v362_v54 }
 0x1b6   :  { %v412_v39 = vmul.f32 %v379_v14, %v356_v35  ;;  %v416_v55 = vmul.f32 %v399_v50, %v360_v49 }
 0x1b8   :  { %v419_v44 = vadd.f32 %v412_v39, %v411_v37 }
 0x1ba   :  { %v420_v48 = vadd.f32 %v419_v44, %v413_v41 }
 0x1bc   :  { %v421_v53 = vadd.f32 %v420_v48, %v414_v46 }
 0x1be   :  { %v422_v56 = vadd.f32 %v421_v53, %v415_v52 }
 0x1c0   :  { %v423_v59 = vadd.f32 %v422_v56, %v416_v55 }
 0x1c2   :  { %v424_v62 = vadd.f32 %v423_v59, %v417_v58 }
 0x1c4   :  { %v425_v0 = vadd.f32 %v424_v62, %v418_v61 }
 0x1c6   :  { %v426_v1 = vrot.slane %v425_v0, 4 }
 0x1c8   :  { %v427_v3 = vadd.f32 %v426_v1, %v425_v0 }
 0x1ca   :  { %v428_v4 = vrot.slane %v427_v3, 2 }
 0x1cc   :  { %v429_v6 = vadd.f32 %v428_v4, %v427_v3 }
 0x1ce   :  { %v430_v8 = vrot.slane %v429_v6, 1 }
 0x1d0   :  { %v431_v10 = vadd.f32 %v430_v8, %v429_v6 }
 0x1d2   :  { %v442_v11 = vadd.f32 %v441_v9, %v431_v10 }
 0x1d4   :  { %443 = vst [vmem:[#allocation3] sm:$0x1] %v442_v11 }
 0x1d5   :  { %545 = shalt.err (!%p542_p4)
}
 0x1d6   :  { %453 = dma.vmem_to_hbm [thread:$0]  %s451_s11, 16, %s718_s7, [#allocation4]  }
 0x1d7   :  { %554 = dma.done.wait [#allocation4], 16  }
 0x1d8   :  { %555 = vsyncadd [#allocation4], 4294967280 }
 0x1d9   :  { %457 = vsyncpa [#allocation4], 1 }

</bundles_post_ra>
